<compile_context>
chip_gen: v7x
topology: tpu7x:2x2x1
jax: 0.10.0
libtpu: 0.0.40
codegen_flags: <defaults>
</compile_context>

<pallas_src>
import jax
import jax.numpy as jnp
from jax.experimental import pallas as pl
from jax.experimental.pallas import tpu as pltpu

BN_EPS = 1e-5


def tictactoe_kernel(
    x_ref,      # (18, TILE_N)   boards, batch on the lane axis
    w_ref,      # (128, 128)     packed constants (folded conv/BN weights, merged heads)
    out_ref,    # (10, TILE_N)   rows 0:9 = softmax policy, row 9 = value
):
    x = x_ref[...]                                   # (18, TILE_N)

    # Static slices of the packed constant block (sublane-aligned starts).
    w1 = w_ref[0:64, 0:18]                           # (64, 18)  conv1 (as FC), BN1 folded
    b1 = w_ref[0:64, 64:65]                          # (64, 1)
    w2 = w_ref[64:80, 0:64]                          # (16, 64)  conv2 (1x1, as FC), BN2 folded
    b2 = w_ref[64:80, 64:65]                         # (16, 1)
    wh = w_ref[80:90, 0:16]                          # (10, 16)  merged policy+value heads
    bh = w_ref[80:90, 64:65]                         # (10, 1)

    # base layer 1: Conv2d(2->64, k=3, p=0) + BN(eval) + ReLU == matmul + bias + relu
    h = jnp.dot(w1, x, preferred_element_type=jnp.float32) + b1     # (64, TILE_N)
    h = jnp.maximum(h, 0.0)

    # base layer 2: Conv2d(64->16, k=1) + BN(eval) + ReLU == matmul + bias + relu
    h = jnp.dot(w2, h, preferred_element_type=jnp.float32) + b2     # (16, TILE_N)
    h = jnp.maximum(h, 0.0)
    # Flatten() is a no-op: spatial dims are already 1x1.

    # merged heads: Linear(16 -> 9+1) in one MXU push
    logits = jnp.dot(wh, h, preferred_element_type=jnp.float32) + bh  # (10, TILE_N)

    # Softmax over rows 0:9 (policy); row 9 (value) passes through untouched.
    # Mask-based epilogue keeps everything on the full (10, TILE_N) vreg set:
    # single dense store, no sublane slicing/concat.
    row = jax.lax.broadcasted_iota(jnp.int32, (10, 1), 0)
    is_pol = row < 9
    mx = jnp.max(jnp.where(is_pol, logits, -jnp.inf), axis=0, keepdims=True)
    e = jnp.exp(logits - mx)
    s = jnp.sum(jnp.where(is_pol, e, 0.0), axis=0, keepdims=True)
    inv = pl.reciprocal(s, approx=False)   # exact; approx=True if 1e-5 parity is relaxed
    out_ref[...] = jnp.where(is_pol, e * inv, logits)


def init_params(key):
    """Deterministic synthetic parameters with the same shapes as the PyTorch module."""
    ks = jax.random.split(key, 12)
    p = {}
    # Conv2d(2, 64, kernel_size=3)
    p["conv1_w"] = 0.1 * jax.random.normal(ks[0], (64, 2, 3, 3), jnp.float32)
    p["conv1_b"] = 0.1 * jax.random.normal(ks[1], (64,), jnp.float32)
    # BatchNorm2d(64)
    p["bn1_gamma"] = jnp.ones((64,), jnp.float32)
    p["bn1_beta"] = jnp.zeros((64,), jnp.float32)
    p["bn1_mean"] = 0.05 * jax.random.normal(ks[2], (64,), jnp.float32)
    p["bn1_var"] = jax.random.uniform(ks[3], (64,), jnp.float32, 0.5, 1.5)
    # Conv2d(64, 16, kernel_size=1)
    p["conv2_w"] = 0.1 * jax.random.normal(ks[4], (16, 64, 1, 1), jnp.float32)
    p["conv2_b"] = 0.1 * jax.random.normal(ks[5], (16,), jnp.float32)
    # BatchNorm2d(16)
    p["bn2_gamma"] = jnp.ones((16,), jnp.float32)
    p["bn2_beta"] = jnp.zeros((16,), jnp.float32)
    p["bn2_mean"] = 0.05 * jax.random.normal(ks[6], (16,), jnp.float32)
    p["bn2_var"] = jax.random.uniform(ks[7], (16,), jnp.float32, 0.5, 1.5)
    # Linear(16, 9) and Linear(16, 1)  (PyTorch stores (out, in))
    p["policy_w"] = 0.1 * jax.random.normal(ks[8], (9, 16), jnp.float32)
    p["policy_b"] = 0.1 * jax.random.normal(ks[9], (9,), jnp.float32)
    p["value_w"] = 0.1 * jax.random.normal(ks[10], (1, 16), jnp.float32)
    p["value_b"] = 0.1 * jax.random.normal(ks[11], (1,), jnp.float32)
    return p


def prepare_params(params):
    """One-time host-side prep.

    Folds eval-mode BN into the conv weights, merges the policy/value heads,
    keeps weights in W(out, in) orientation for the batch-on-lanes layout, and
    packs everything into one (128, 128) f32 constant block:
        rows  0:64, cols 0:18  -> W1   rows  0:64, col 64 -> b1
        rows 64:80, cols 0:64  -> W2   rows 64:80, col 64 -> b2
        rows 80:90, cols 0:16  -> Wh   rows 80:90, col 64 -> bh
    """
    # y = ((W1 x + b1) - mean) * gamma/sqrt(var+eps) + beta = (W1*s1) x + ((b1-mean)*s1 + beta)
    s1 = params["bn1_gamma"] * jax.lax.rsqrt(params["bn1_var"] + BN_EPS)        # (64,)
    w1 = params["conv1_w"].reshape(64, 18) * s1[:, None]                        # (64, 18)
    b1 = (params["conv1_b"] - params["bn1_mean"]) * s1 + params["bn1_beta"]     # (64,)

    s2 = params["bn2_gamma"] * jax.lax.rsqrt(params["bn2_var"] + BN_EPS)        # (16,)
    w2 = params["conv2_w"].reshape(16, 64) * s2[:, None]                        # (16, 64)
    b2 = (params["conv2_b"] - params["bn2_mean"]) * s2 + params["bn2_beta"]     # (16,)

    wh = jnp.concatenate([params["policy_w"], params["value_w"]], axis=0)       # (10, 16)
    bh = jnp.concatenate([params["policy_b"], params["value_b"]], axis=0)       # (10,)

    blk = jnp.zeros((128, 128), jnp.float32)
    blk = blk.at[0:64, 0:18].set(w1.astype(jnp.float32))
    blk = blk.at[64:80, 0:64].set(w2.astype(jnp.float32))
    blk = blk.at[80:90, 0:16].set(wh.astype(jnp.float32))
    blk = blk.at[0:64, 64].set(b1.astype(jnp.float32))
    blk = blk.at[64:80, 64].set(b2.astype(jnp.float32))
    blk = blk.at[80:90, 64].set(bh.astype(jnp.float32))
    return blk


def _round_up(v, m):
    return ((v + m - 1) // m) * m


def tictactoe_forward(x_nchw, w_block, max_tile_n=8192):
    """x_nchw: (N, 2, 3, 3) float32 -> (policy (N, 9) [squeezed], value (N, 1)).

    `w_block` comes from prepare_params().  The batch rides the lane axis:
    inputs are presented as (18, N_pad), outputs as (10, N_pad) (wrapper-side
    transpose is layout plumbing, done once outside the kernel).  tile_n is a
    multiple of 256 and capped so the grid has >=2 steps when the padded batch
    allows it (lets the "parallel" axis shard across both v7x TensorCores).
    """
    n = x_nchw.shape[0]
    # Batch-on-lanes layout: (18, N) with the 18 in (c, h, w) order (matches W1 fold).
    x_t = x_nchw.astype(jnp.float32).reshape(n, 2 * 3 * 3).T        # (18, N)

    align = 256                                   # lane tile / MXU-N alignment
    n_pad = _round_up(max(n, 1), align)
    tile_n = min(max_tile_n, _round_up(pl.cdiv(n_pad, 2), align))   # >=2 tiles when possible
    n_pad = _round_up(n_pad, tile_n)
    if n_pad != n:
        x_t = jnp.pad(x_t, ((0, 0), (0, n_pad - n)))

    grid = (n_pad // tile_n,)
    batch = lambda i: (0, i)     # tile the lane (batch) axis
    const = lambda i: (0, 0)     # packed weights resident across the whole grid

    out = pl.pallas_call(
        tictactoe_kernel,
        out_shape=jax.ShapeDtypeStruct((10, n_pad), jnp.float32),
        grid=grid,
        in_specs=[
            pl.BlockSpec((18, tile_n), batch),     # boards
            pl.BlockSpec((128, 128), const),       # packed weights/biases
        ],
        out_specs=pl.BlockSpec((10, tile_n), batch),
        compiler_params=pltpu.CompilerParams(
            dimension_semantics=("parallel",),     # shard batch tiles across TCs (v7x)
        ),
    )(x_t, w_block)

    policy = out[0:9, :n].T      # (N, 9)
    value = out[9:10, :n].T      # (N, 1)
    # Matches PyTorch: policy_head(base).squeeze()
    return jnp.squeeze(policy), value


def reference_forward(x_nchw, params):
    """Pure-JAX reference (same math as the PyTorch module, eval-mode BN)."""
    n = x_nchw.shape[0]
    x = x_nchw.reshape(n, 18).astype(jnp.float32)
    h = x @ params["conv1_w"].reshape(64, 18).T + params["conv1_b"]
    h = (h - params["bn1_mean"]) / jnp.sqrt(params["bn1_var"] + BN_EPS) \
        * params["bn1_gamma"] + params["bn1_beta"]
    h = jnp.maximum(h, 0.0)
    h = h @ params["conv2_w"].reshape(16, 64).T + params["conv2_b"]
    h = (h - params["bn2_mean"]) / jnp.sqrt(params["bn2_var"] + BN_EPS) \
        * params["bn2_gamma"] + params["bn2_beta"]
    h = jnp.maximum(h, 0.0)
    logits = h @ params["policy_w"].T + params["policy_b"]
    policy = jax.nn.softmax(logits, axis=1)
    value = h @ params["value_w"].T + params["value_b"]
    return jnp.squeeze(policy), value


if __name__ == "__main__":
    key = jax.random.PRNGKey(0)
    pkey, xkey = jax.random.split(key)
    params = init_params(pkey)
    w_block = prepare_params(params)   # one-time BN fold + head merge + packing (outside serving loop)

    # Small batch of tic-tac-toe boards: (N, 2, 3, 3), NCHW like PyTorch.
    batch = 2
    x = jax.random.bernoulli(xkey, 0.4, (batch, 2, 3, 3)).astype(jnp.float32)

    policy, value = tictactoe_forward(x, w_block)
    policy = jax.block_until_ready(policy)
    value = jax.block_until_ready(value)

    ref_policy, ref_value = reference_forward(x, params)
    assert policy.shape == (batch, 9) and value.shape == (batch, 1)
    assert jnp.allclose(policy, ref_policy, atol=1e-5, rtol=1e-5)
    assert jnp.allclose(value, ref_value, atol=1e-5, rtol=1e-5)
    assert jnp.allclose(jnp.sum(policy, axis=1), 1.0, atol=1e-5)

    print("KERNEL_OK")
</pallas_src>

<mosaic_0001>
module attributes {stable_mosaic.version = 11 : i64} {
  func.func @tictactoe_kernel(%arg0: i32, %arg1: memref<18x256xf32, #tpu.memory_space<vmem>>, %arg2: memref<128x128xf32, #tpu.memory_space<vmem>>, %arg3: memref<10x256xf32, #tpu.memory_space<vmem>>) attributes {dimension_semantics = [#tpu.dimension_semantics<parallel>], iteration_bounds = array<i64: 1>, scalar_prefetch = 0 : i64, scratch_operands = 0 : i64, tpu.core_type = #tpu.core_type<tc>, window_params = [{transform_indices = @transform_0, window_bounds = array<i64: 18, 256>}, {pipeline_mode = #tpu.pipeline_mode<synchronous>, transform_indices = @transform_1, window_bounds = array<i64: 128, 128>}, {transform_indices = @transform_2, window_bounds = array<i64: 10, 256>}]} {
    %c0 = arith.constant 0 : index
    %c0_0 = arith.constant 0 : index
    %0 = vector.load %arg1[%c0, %c0_0] : memref<18x256xf32, #tpu.memory_space<vmem>>, vector<18x256xf32>
    %c0_1 = arith.constant 0 : index
    %c0_2 = arith.constant 0 : index
    %1 = vector.load %arg2[%c0_1, %c0_2] : memref<128x128xf32, #tpu.memory_space<vmem>>, vector<64x18xf32>
    %c0_3 = arith.constant 0 : index
    %c64 = arith.constant 64 : index
    %2 = vector.load %arg2[%c0_3, %c64] : memref<128x128xf32, #tpu.memory_space<vmem>>, vector<64x1xf32>
    %c64_4 = arith.constant 64 : index
    %c0_5 = arith.constant 0 : index
    %3 = vector.load %arg2[%c64_4, %c0_5] : memref<128x128xf32, #tpu.memory_space<vmem>>, vector<16x64xf32>
    %c64_6 = arith.constant 64 : index
    %c64_7 = arith.constant 64 : index
    %4 = vector.load %arg2[%c64_6, %c64_7] : memref<128x128xf32, #tpu.memory_space<vmem>>, vector<16x1xf32>
    %c80 = arith.constant 80 : index
    %c0_8 = arith.constant 0 : index
    %5 = vector.load %arg2[%c80, %c0_8] : memref<128x128xf32, #tpu.memory_space<vmem>>, vector<10x16xf32>
    %c80_9 = arith.constant 80 : index
    %c64_10 = arith.constant 64 : index
    %6 = vector.load %arg2[%c80_9, %c64_10] : memref<128x128xf32, #tpu.memory_space<vmem>>, vector<10x1xf32>
    %cst = arith.constant dense<0.000000e+00> : vector<64x256xf32>
    %7 = tpu.matmul %1, %0, %cst {dimension_numbers = #tpu.dot_dimension_numbers<[1], [0], [0], [1], [0, 0, 1, 1], [], []>} : vector<64x18xf32>, vector<18x256xf32>, vector<64x256xf32> -> vector<64x256xf32>
    %8 = vector.broadcast %2 : vector<64x1xf32> to vector<64x256xf32>
    %9 = arith.addf %7, %8 : vector<64x256xf32>
    %cst_11 = arith.constant 0.000000e+00 : f32
    %10 = vector.broadcast %cst_11 : f32 to vector<64x256xf32>
    %11 = arith.maximumf %9, %10 : vector<64x256xf32>
    %cst_12 = arith.constant dense<0.000000e+00> : vector<16x256xf32>
    %12 = tpu.matmul %3, %11, %cst_12 {dimension_numbers = #tpu.dot_dimension_numbers<[1], [0], [0], [1], [0, 0, 1, 1], [], []>} : vector<16x64xf32>, vector<64x256xf32>, vector<16x256xf32> -> vector<16x256xf32>
    %13 = vector.broadcast %4 : vector<16x1xf32> to vector<16x256xf32>
    %14 = arith.addf %12, %13 : vector<16x256xf32>
    %cst_13 = arith.constant 0.000000e+00 : f32
    %15 = vector.broadcast %cst_13 : f32 to vector<16x256xf32>
    %16 = arith.maximumf %14, %15 : vector<16x256xf32>
    %cst_14 = arith.constant dense<0.000000e+00> : vector<10x256xf32>
    %17 = tpu.matmul %5, %16, %cst_14 {dimension_numbers = #tpu.dot_dimension_numbers<[1], [0], [0], [1], [0, 0, 1, 1], [], []>} : vector<10x16xf32>, vector<16x256xf32>, vector<10x256xf32> -> vector<10x256xf32>
    %18 = vector.broadcast %6 : vector<10x1xf32> to vector<10x256xf32>
    %19 = arith.addf %17, %18 : vector<10x256xf32>
    %20 = tpu.iota {dimensions = array<i32: 0>} : vector<10x1xi32>
    %c9_i32 = arith.constant 9 : i32
    %21 = vector.broadcast %c9_i32 : i32 to vector<10x1xi32>
    %22 = arith.cmpi slt, %20, %21 : vector<10x1xi32>
    %cst_15 = arith.constant 0xFF800000 : f32
    %23 = vector.shape_cast %22 : vector<10x1xi1> to vector<10x1xi1>
    %24 = vector.broadcast %23 : vector<10x1xi1> to vector<10x256xi1>
    %25 = vector.broadcast %cst_15 : f32 to vector<10x256xf32>
    %26 = arith.select %24, %19, %25 : vector<10x256xi1>, vector<10x256xf32>
    %cst_16 = arith.constant dense<0xFF800000> : vector<256xf32>
    %27 = vector.multi_reduction <maximumf>, %26, %cst_16 [0] : vector<10x256xf32> to vector<256xf32>
    %28 = vector.shape_cast %27 : vector<256xf32> to vector<1x256xf32>
    %29 = vector.broadcast %28 : vector<1x256xf32> to vector<10x256xf32>
    %30 = arith.subf %19, %29 : vector<10x256xf32>
    %31 = math.exp %30 : vector<10x256xf32>
    %cst_17 = arith.constant 0.000000e+00 : f32
    %32 = vector.shape_cast %22 : vector<10x1xi1> to vector<10x1xi1>
    %33 = vector.broadcast %32 : vector<10x1xi1> to vector<10x256xi1>
    %34 = vector.broadcast %cst_17 : f32 to vector<10x256xf32>
    %35 = arith.select %33, %31, %34 : vector<10x256xi1>, vector<10x256xf32>
    %cst_18 = arith.constant dense<0.000000e+00> : vector<256xf32>
    %36 = vector.multi_reduction <add>, %35, %cst_18 [0] : vector<10x256xf32> to vector<256xf32>
    %37 = vector.shape_cast %36 : vector<256xf32> to vector<1x256xf32>
    %38 = tpu.reciprocal %37 : vector<1x256xf32> -> vector<1x256xf32>
    %39 = vector.broadcast %38 : vector<1x256xf32> to vector<10x256xf32>
    %40 = arith.mulf %31, %39 : vector<10x256xf32>
    %41 = vector.shape_cast %22 : vector<10x1xi1> to vector<10x1xi1>
    %42 = vector.broadcast %41 : vector<10x1xi1> to vector<10x256xi1>
    %43 = arith.select %42, %40, %19 : vector<10x256xi1>, vector<10x256xf32>
    %c0_19 = arith.constant 0 : index
    %c0_20 = arith.constant 0 : index
    %44 = vector.load %arg3[%c0_19, %c0_20] : memref<10x256xf32, #tpu.memory_space<vmem>>, vector<10x256xf32>
    tpu.vector_store %arg3[%c0_19, %c0_20], %43 {strides = array<i32>} : memref<10x256xf32, #tpu.memory_space<vmem>>, vector<10x256xf32>,
    return
  }
  func.func @transform_0(%arg0: i32) -> (i32, i32) {
    %c0_i32 = arith.constant 0 : i32
    %c0_i32_0 = arith.constant 0 : i32
    return %c0_i32, %arg0 : i32, i32
  }
  func.func @transform_1(%arg0: i32) -> (i32, i32) {
    %c0_i32 = arith.constant 0 : i32
    %c0_i32_0 = arith.constant 0 : i32
    %c0_i32_1 = arith.constant 0 : i32
    return %c0_i32, %c0_i32_0 : i32, i32
  }
  func.func @transform_2(%arg0: i32) -> (i32, i32) {
    %c0_i32 = arith.constant 0 : i32
    %c0_i32_0 = arith.constant 0 : i32
    return %c0_i32, %arg0 : i32, i32
  }
}

</mosaic_0001>

<bundles_post_ra>
// kernel: tpu_custom_call.1
= control target key start
LH: loop header
LB: loop body
LE: loop exit
PB: predicated region body
PF: predicated region fallthrough
CT: control target
= control target key end

     0   :  { %7 = vsyncpa [#allocation3], 0  ;;  %s798_s0 = inlined_call_operand.hbm [shape: f32[18,256], index: 0, kind: input, shape index: {}]   ;;  %s799_s1 = inlined_call_operand.hbm [shape: f32[128,128], index: 1, kind: input, shape index: {}]   ;;  %s800_s2 = inlined_call_operand.hbm [shape: f32[10,256], index: 2, kind: output, shape index: {}]  }
   0x1   :  { %8 = vsyncpa [#allocation6], 0 }
   0x2   :  { %9 = vsyncpa [#allocation4], 0  ;;  %s665_s9 = smov [#allocation2]   ;;  %s593_s13 = scalar_lea.hbm %s798_s0, 768 }
   0x3   :  { %s15_s10 = sshll.u32 %s665_s9, 4  ;;  %p594_p0 = scmp.ne.s32.totalorder %s798_s0, %s593_s13  ;;  %s16_s10 = int_to_ptr.vmem [resolvable:$true] %s15_s10 }
   0x4   :  { %p597_p1 = scmp.lt.u32.totalorder %s593_s13, %s798_s0 }
   0x6   :  { %p599_p2 = pnand %p597_p1, %p594_p0 }
   0x8   :  { %602 = shalt.err (!%p599_p2)
}
   0x9   :  { %s603_s18 = scalar_lea.vmem %s16_s10, 768  ;;  %p608_p4 = scmp.lt.s32.totalorder %s16_s10, %s16_s10 }
   0xa   :  { %p604_p3 = scmp.ne.s32.totalorder %s16_s10, %s603_s18  ;;  %p609_p5 = scmp.lt.s32.totalorder %s603_s18, %s603_s18 }
   0xc   :  { %p610_p6 = por %p609_p5, %p608_p4 }
   0xe   :  { %p611_p7 = pnand %p610_p6, %p604_p3 }
  0x10   :  { %614 = shalt.err (!%p611_p7)
}
  0x11   :  { %s666_s19 = smov 256   ;;  %s667_s20 = smov 16  }
  0x12   :  { %21 = dma.hbm_to_vmem [thread:$0]  %s798_s0, 768, %s16_s10, [#allocation3], %s666_s19, %s666_s19, %s667_s20  }
  0x13   :  { %s668_s23 = smov [#allocation5]   ;;  %s615_s27 = scalar_lea.hbm %s799_s1, 2048 }
  0x14   :  { %s27_s24 = sshll.u32 %s668_s23, 4  ;;  %p616_p8 = scmp.ne.s32.totalorder %s799_s1, %s615_s27  ;;  %s28_s24 = int_to_ptr.vmem [resolvable:$true] %s27_s24 }
  0x15   :  { %p619_p9 = scmp.lt.u32.totalorder %s615_s27, %s799_s1 }
  0x17   :  { %p621_p10 = pnand %p619_p9, %p616_p8 }
  0x19   :  { %624 = shalt.err (!%p621_p10)
}
  0x1a   :  { %s625_s4 = scalar_lea.vmem %s28_s24, 2048  ;;  %p630_p12 = scmp.lt.s32.totalorder %s28_s24, %s28_s24 }
  0x1b   :  { %p626_p11 = scmp.ne.s32.totalorder %s28_s24, %s625_s4  ;;  %p631_p13 = scmp.lt.s32.totalorder %s625_s4, %s625_s4 }
  0x1d   :  { %p632_p0 = por %p631_p13, %p630_p12 }
  0x1f   :  { %p633_p1 = pnand %p632_p0, %p626_p11 }
  0x21   :  { %636 = shalt.err (!%p633_p1)
}
  0x22   :  { %s669_s0 = smov 128   ;;  %s670_s5 = smov 8  }
  0x23   :  { %33 = dma.hbm_to_vmem [thread:$0]  %s799_s1, 2048, %s28_s24, [#allocation6], %s669_s0, %s669_s0, %s670_s5  }
  0x24   :  { %659 = dma.done.wait [#allocation3], 768  }
  0x25   :  { %660 = vsyncadd [#allocation3], 4294966528 }
  0x26   :  { %661 = dma.done.wait [#allocation6], 2048  }
  0x27   :  { %662 = vsyncadd [#allocation6], 4294965248  ;;  %v671_v0 = vmov 0.0   ;;  %v672_v1 = vmov 64   ;;  %v41_v2 = vld [vmem:[#allocation2 + $0x8] sm:$0xff]  ;;  %v43_v3 = vld [vmem:[#allocation2 + $0x18] sm:$0xff] }
  0x28   :  { %186 = vmatprep.mubr.f32.mxu0 %v671_v0  ;;  %579 = vset.pattern.permute.xlu0 %v672_v1  ;;  %v40_v4 = vld [vmem:[#allocation2] sm:$0xff]  ;;  %v546_v5 = vpack.c.bf16 %v43_v3, %v41_v2  ;;  %v42_v6 = vld [vmem:[#allocation2 + $0x10] sm:$0xff]  ;;  %v45_v8 = vld [vmem:[#allocation2 + $0x28] sm:$0x3]  ;;  %vm115_vm0 = vcmask 1041408   ;;  %vm98_vm1 = vcmask 146432  }
  0x29   :  { %580 = vset.pattern.permute.xlu1 %v672_v1  ;;  %330 = vmatprep.mubr.f32.mxu1 %v671_v0  ;;  %v548_v7 = vpack.c.bf16 %v42_v6, %v40_v4  ;;  %v46_v9 = vld [vmem:[#allocation5] sm:$0xff]  ;;  %v48_v10 = vld [vmem:[#allocation5 + $0x10] sm:$0xff]  ;;  %v47_v12 = vld [vmem:[#allocation5 + $0x8] sm:$0xff]  ;;  %vm261_vm2 = vcmask 523264   ;;  %vm357_vm3 = vcmask 130048   ;;  %s673_s1 = smov [#allocation7]  }
  0x2a   :  { %547 = vmatprep.subr.bf16.mxu0 %v546_v5  ;;  %60 = vperm.xlu0 %579, %v46_v9   ;;  %v44_v11 = vld [vmem:[#allocation2 + $0x20] sm:$0x3]  ;;  %v49_v13 = vld [vmem:[#allocation5 + $0x18] sm:$0xff]  ;;  %v50_v14 = vld [vmem:[#allocation5 + $0x20] sm:$0xff]  ;;  %s519_s8 = sshll.u32 %s673_s1, 4  ;;  %s520_s8 = int_to_ptr.vmem [resolvable:$true] %s519_s8 }
  0x2b   :  { %549 = vmatpush1.bf16.msra.mxu0 %v548_v7  ;;  %70 = vperm.xlu1 %580, %v48_v10   ;;  %v51_v15 = vld [vmem:[#allocation5 + $0x28] sm:$0xff]  ;;  %v52_v16 = vld [vmem:[#allocation5 + $0x30] sm:$0xff]  ;;  %v53_v17 = vld [vmem:[#allocation5 + $0x38] sm:$0xff]  ;;  %s637_s9 = scalar_lea.vmem %s520_s8, 512  ;;  %p642_p3 = scmp.lt.s32.totalorder %s520_s8, %s520_s8 }
  0x2c   :  { %532 = vmatprep.subr.msk.mxu0 %vm115_vm0, %v45_v8  ;;  %v724_v18 = vld [vmem:[#allocation5 + $0x40] sm:$0xff]  ;;  %v727_v19 = vld [vmem:[#allocation5 + $0x48] sm:$0xff]  ;;  %v732_v20 = vld [vmem:[#allocation5 + $0x58] sm:$0x3]  ;;  %p638_p2 = scmp.ne.s32.totalorder %s520_s8, %s637_s9  ;;  %p643_p4 = scmp.lt.s32.totalorder %s637_s9, %s637_s9 }
  0x2d   :  { %v735_v21 = vld [vmem:[#allocation5 + $0x50] sm:$0xff] }
  0x2e   :  { %65 = vperm.xlu0 %579, %v47_v12   ;;  %p644_p5 = por %p643_p4, %p642_p3 }
  0x2f   :  { %533 = vmatpush1.msk.msra.mxu0 %vm115_vm0, %v44_v11  ;;  %75 = vperm.xlu1 %580, %v49_v13  }
  0x30   :  { %534 = vmatmul.mubr.msk.f32.vlgmr.msra.gmra.mrb[0].mxu0 %vm98_vm1, %v46_v9  ;;  %p645_p6 = pnand %p644_p5, %p638_p2 }
  0x31   :  { %192 = vmatprep.mubr.f32.mxu0 %v671_v0 }
  0x32   :  { %80 = vperm.xlu0 %579, %v50_v14  }
  0x33   :  { %85 = vperm.xlu1 %580, %v51_v15  }
  0x34   :  { %535 = vmatmul.mubr.msk.f32.gmra.mrb[2].mxu0 %vm98_vm1, %v47_v12 }
  0x35   :  { %198 = vmatprep.mubr.f32.mxu0 %v671_v0 }
  0x36   :  { %90 = vperm.xlu0 %579, %v52_v16  }
  0x37   :  { %95 = vperm.xlu1 %580, %v53_v17  }
  0x38   :  { %536 = vmatmul.mubr.msk.f32.gmra.mrb[4].mxu0 %vm98_vm1, %v48_v10 }
  0x39   :  { %204 = vmatprep.mubr.f32.mxu0 %v671_v0 }
  0x3a   :  { %253 = vperm.xlu0 %579, %v724_v18  }
  0x3b   :  { %258 = vperm.xlu1 %580, %v727_v19  }
  0x3c   :  { %537 = vmatmul.mubr.msk.f32.gmra.mrb[6].mxu0 %vm98_vm1, %v49_v13 }
  0x3d   :  { %210 = vmatprep.mubr.f32.mxu0 %v671_v0 }
  0x3e   :  { %354 = vperm.xlu0 %579, %v732_v20  }
  0x3f   :  { %349 = vperm.xlu1 %580, %v735_v21  }
  0x40   :  { %538 = vmatmul.mubr.msk.f32.gmra.mrb[8].mxu0 %vm98_vm1, %v50_v14 }
  0x41   :  { %216 = vmatprep.mubr.f32.mxu0 %v671_v0 }
  0x44   :  { %539 = vmatmul.mubr.msk.f32.gmra.mrb[10].mxu0 %vm98_vm1, %v51_v15 }
  0x45   :  { %222 = vmatprep.mubr.f32.mxu0 %v671_v0 }
  0x48   :  { %540 = vmatmul.mubr.msk.f32.gmra.mrb[12].mxu0 %vm98_vm1, %v52_v16 }
  0x49   :  { %228 = vmatprep.mubr.f32.mxu0 %v671_v0 }
  0x4c   :  { %541 = vmatmul.mubr.msk.f32.gmra.mrb[14].mxu0 %vm98_vm1, %v53_v17 }
  0xa9   :  { %v61_v22 = vpop.permute.xlu0 %60 }
  0xaa   :  { %v71_v31 = vpop.permute.xlu1 %70 }
  0xad   :  { %v66_v26 = vpop.permute.xlu0 %65 }
  0xae   :  { %v76_v42 = vpop.permute.xlu1 %75 }
  0xb1   :  { %v81_v55 = vpop.permute.xlu0 %80 }
  0xb2   :  { %v86_v58 = vpop.permute.xlu1 %85 }
  0xb5   :  { %v91_v8 = vpop.permute.xlu0 %90 }
  0xb6   :  { %v96_v11 = vpop.permute.xlu1 %95 }
 0x103   :  { %v188_v23 = vpop.f32.mrb[0].mxu0 }
 0x104   :  { %v190_v24 = vpop.f32.mrb[1].mxu0  ;;  %v189_v25 = vadd.f32 %v188_v23, %v61_v22 }
 0x105   :  { %v191_v27 = vadd.f32 %v190_v24, %v61_v22 }
 0x106   :  { %v235_v33 = vmax.f32 %v189_v25, 0.0 }
 0x107   :  { %v194_v28 = vpop.f32.mrb[2].mxu0  ;;  %v236_v35 = vmax.f32 %v191_v27, 0.0 }
 0x108   :  { %v195_v29 = vadd.f32 %v194_v28, %v66_v26  ;;  %v196_v30 = vpop.f32.mrb[3].mxu0 }
 0x109   :  { %v197_v32 = vadd.f32 %v196_v30, %v66_v26 }
 0x10a   :  { %v237_v34 = vmax.f32 %v195_v29, 0.0  ;;  %v254_v29 = vpop.permute.xlu0 %253 }
 0x10b   :  { %v238_v36 = vmax.f32 %v197_v32, 0.0  ;;  %v200_v37 = vpop.f32.mrb[4].mxu0 }
 0x10c   :  { %v202_v38 = vpop.f32.mrb[5].mxu0  ;;  %v552_v39 = vpack.c.bf16 %v237_v34, %v235_v33  ;;  %v201_v41 = vadd.f32 %v200_v37, %v71_v31 }
 0x10d   :  { %v550_v40 = vpack.c.bf16 %v238_v36, %v236_v35  ;;  %v203_v43 = vadd.f32 %v202_v38, %v71_v31  ;;  %v259_v31 = vpop.permute.xlu1 %258 }
 0x10e   :  { %v239_v48 = vmax.f32 %v201_v41, 0.0 }
 0x10f   :  { %v206_v44 = vpop.f32.mrb[6].mxu0  ;;  %551 = vmatprep.subr.bf16.mxu1 %v550_v40  ;;  %v240_v50 = vmax.f32 %v203_v43, 0.0 }
 0x110   :  { %v207_v45 = vadd.f32 %v206_v44, %v76_v42  ;;  %v208_v46 = vpop.f32.mrb[7].mxu0  ;;  %553 = vmatpush1.bf16.msra.mxu1 %v552_v39 }
 0x111   :  { %v209_v47 = vadd.f32 %v208_v46, %v76_v42  ;;  %v355_v46 = vpop.permute.xlu0 %354 }
 0x112   :  { %v241_v49 = vmax.f32 %v207_v45, 0.0 }
 0x113   :  { %v242_v51 = vmax.f32 %v209_v47, 0.0  ;;  %v212_v52 = vpop.f32.mrb[8].mxu0 }
 0x114   :  { %v556_v53 = vpack.c.bf16 %v241_v49, %v239_v48  ;;  %v214_v54 = vpop.f32.mrb[9].mxu0  ;;  %v213_v57 = vadd.f32 %v212_v52, %v81_v55 }
 0x115   :  { %v554_v56 = vpack.c.bf16 %v242_v51, %v240_v50  ;;  %v215_v59 = vadd.f32 %v214_v54, %v81_v55  ;;  %v350_v50 = vpop.permute.xlu1 %349 }
 0x116   :  { %v243_v1 = vmax.f32 %v213_v57, 0.0 }
 0x117   :  { %v218_v60 = vpop.f32.mrb[10].mxu0  ;;  %555 = vmatprep.subr.bf16.mxu1 %v554_v56  ;;  %v244_v3 = vmax.f32 %v215_v59, 0.0 }
 0x118   :  { %v219_v61 = vadd.f32 %v218_v60, %v86_v58  ;;  %v220_v62 = vpop.f32.mrb[11].mxu0  ;;  %557 = vmatpush1.bf16.msra.mxu1 %v556_v53 }
 0x119   :  { %v221_v63 = vadd.f32 %v220_v62, %v86_v58 }
 0x11a   :  { %v245_v2 = vmax.f32 %v219_v61, 0.0 }
 0x11b   :  { %v246_v4 = vmax.f32 %v221_v63, 0.0  ;;  %v224_v5 = vpop.f32.mrb[12].mxu0 }
 0x11c   :  { %v560_v6 = vpack.c.bf16 %v245_v2, %v243_v1  ;;  %v226_v7 = vpop.f32.mrb[13].mxu0  ;;  %v225_v10 = vadd.f32 %v224_v5, %v91_v8 }
 0x11d   :  { %v558_v9 = vpack.c.bf16 %v246_v4, %v244_v3  ;;  %v227_v12 = vadd.f32 %v226_v7, %v91_v8 }
 0x11e   :  { %v247_v17 = vmax.f32 %v225_v10, 0.0 }
 0x11f   :  { %v230_v13 = vpop.f32.mrb[14].mxu0  ;;  %559 = vmatprep.subr.bf16.mxu1 %v558_v9  ;;  %v248_v23 = vmax.f32 %v227_v12, 0.0 }
 0x120   :  { %v231_v14 = vadd.f32 %v230_v13, %v96_v11  ;;  %v232_v15 = vpop.f32.mrb[15].mxu0  ;;  %561 = vmatpush1.bf16.msra.mxu1 %v560_v6 }
 0x121   :  { %v233_v16 = vadd.f32 %v232_v15, %v96_v11 }
 0x122   :  { %v249_v22 = vmax.f32 %v231_v14, 0.0 }
 0x123   :  { %v250_v24 = vmax.f32 %v233_v16, 0.0 }
 0x124   :  { %v564_v25 = vpack.c.bf16 %v249_v22, %v247_v17 }
 0x125   :  { %v562_v26 = vpack.c.bf16 %v250_v24, %v248_v23 }
 0x127   :  { %563 = vmatprep.subr.bf16.mxu1 %v562_v26 }
 0x128   :  { %565 = vmatpush1.bf16.msra.mxu1 %v564_v25 }
 0x12b   :  { %542 = vmatmul.mubr.msk.f32.vlgmr.msra.gmra.mrb[0].mxu1 %vm261_vm2, %v724_v18 }
 0x12c   :  { %336 = vmatprep.mubr.f32.mxu1 %v671_v0 }
 0x12f   :  { %543 = vmatmul.mubr.msk.f32.gmra.mrb[2].mxu1 %vm261_vm2, %v727_v19  ;;  %v439_v19 = vlaneseq }
 0x130   :  { %426 = vmatprep.mubr.f32.mxu1 %v671_v0 }
 0x131   :  { %v440_v42 = vshrl.u32 %v439_v19, 7 }
 0x133   :  { %v754_v44 = vadd.s32 8, %v440_v42 }
 0x135   :  { %vm443_vm4 = vcmp.lt.s32.totalorder %v754_v44, 9 }
 0x1fe   :  { %v332_v27 = vpop.f32.mrb[0].mxu1 }
 0x1ff   :  { %v334_v28 = vpop.f32.mrb[1].mxu1  ;;  %v333_v30 = vadd.f32 %v332_v27, %v254_v29 }
 0x200   :  { %v335_v32 = vadd.f32 %v334_v28, %v254_v29 }
 0x201   :  { %v343_v37 = vmax.f32 %v333_v30, 0.0 }
 0x202   :  { %v338_v33 = vpop.f32.mrb[2].mxu1  ;;  %v344_v39 = vmax.f32 %v335_v32, 0.0 }
 0x203   :  { %v339_v34 = vadd.f32 %v338_v33, %v259_v31  ;;  %v340_v35 = vpop.f32.mrb[3].mxu1 }
 0x204   :  { %v341_v36 = vadd.f32 %v340_v35, %v259_v31 }
 0x205   :  { %v345_v38 = vmax.f32 %v339_v34, 0.0 }
 0x206   :  { %v346_v18 = vmax.f32 %v341_v36, 0.0 }
 0x207   :  { %v568_v40 = vpack.c.bf16 %v345_v38, %v343_v37 }
 0x208   :  { %v566_v41 = vpack.c.bf16 %v346_v18, %v344_v39 }
 0x20a   :  { %567 = vmatprep.subr.bf16.mxu1 %v566_v41 }
 0x20b   :  { %569 = vmatpush1.bf16.msra.mxu1 %v568_v40 }
 0x20e   :  { %544 = vmatmul.mubr.msk.f32.vlgmr.msra.gmra.mrb[4].mxu1 %vm357_vm3, %v735_v21 }
 0x20f   :  { %432 = vmatprep.mubr.f32.mxu1 %v671_v0 }
 0x212   :  { %545 = vmatmul.mubr.msk.f32.gmra.mrb[6].mxu1 %vm357_vm3, %v732_v20 }
 0x2e1   :  { %v428_v43 = vpop.f32.mrb[4].mxu1 }
 0x2e2   :  { %v430_v45 = vpop.f32.mrb[5].mxu1  ;;  %v429_v21 = vadd.f32 %v428_v43, %v350_v50 }
 0x2e3   :  { %v431_v20 = vadd.f32 %v430_v45, %v350_v50 }
 0x2e5   :  { %v434_v47 = vpop.f32.mrb[6].mxu1 }
 0x2e6   :  { %v757_v48 = vadd.f32 %v434_v47, %v355_v46  ;;  %v436_v49 = vpop.f32.mrb[7].mxu1 }
 0x2e7   :  { %v759_v51 = vadd.f32 %v436_v49, %v355_v46 }
 0x2e8   :  { %v450_v0 = vsel %vm443_vm4, %v757_v48, -inf }
 0x2e9   :  { %v452_v52 = vsel %vm115_vm0, %v450_v0, -inf  ;;  %v451_v53 = vsel %vm443_vm4, %v759_v51, -inf }
 0x2ea   :  { %v453_v54 = vmax.f32 %v429_v21, %v452_v52  ;;  %v460_v55 = vsel %vm115_vm0, %v451_v53, -inf }
 0x2eb   :  { %v461_v56 = vmax.f32 %v431_v20, %v460_v55 }
 0x2ec   :  { %v454_v57 = vrot.slane %v453_v54, 4 }
 0x2ed   :  { %v462_v58 = vrot.slane %v461_v56, 4 }
 0x2ee   :  { %v455_v59 = vmax.f32 %v453_v54, %v454_v57 }
 0x2ef   :  { %v463_v60 = vmax.f32 %v461_v56, %v462_v58 }
 0x2f0   :  { %v456_v61 = vrot.slane %v455_v59, 2 }
 0x2f1   :  { %v464_v62 = vrot.slane %v463_v60, 2 }
 0x2f2   :  { %v457_v63 = vmax.f32 %v455_v59, %v456_v61 }
 0x2f3   :  { %v465_v1 = vmax.f32 %v463_v60, %v464_v62 }
 0x2f4   :  { %v458_v2 = vrot.slane %v457_v63, 1 }
 0x2f5   :  { %v466_v3 = vrot.slane %v465_v1, 1 }
 0x2f6   :  { %v459_v4 = vmax.f32 %v457_v63, %v458_v2 }
 0x2f7   :  { %v467_v5 = vmax.f32 %v465_v1, %v466_v3 }
 0x2f8   :  { %v468_v6 = vsub.f32 %v429_v21, %v459_v4  ;;  %v470_v7 = vsub.f32 %v757_v48, %v459_v4 }
 0x2f9   :  { %v469_v8 = vsub.f32 %v431_v20, %v467_v5  ;;  %v471_v9 = vsub.f32 %v759_v51, %v467_v5 }
 0x2fa   :  { %v472_v10 = vmul.f32 1.442695, %v468_v6  ;;  %v476_v11 = vmul.f32 1.442695, %v470_v7 }
 0x2fb   :  { %v478_v12 = vmul.f32 1.442695, %v471_v9  ;;  %v474_v13 = vmul.f32 1.442695, %v469_v8 }
 0x2fc   :  { %581 = vpow2.f32 %v476_v11 }
 0x2fd   :  { %583 = vpow2.f32 %v472_v10 }
 0x2fe   :  { %585 = vpow2.f32 %v478_v12 }
 0x2ff   :  { %587 = vpow2.f32 %v474_v13 }
 0x306   :  { %v582_v14 = vpop.eup %581 }
 0x307   :  { %v584_v15 = vpop.eup %583  ;;  %v482_v16 = vsel %vm443_vm4, %v582_v14, 0.0 }
 0x308   :  { %v586_v17 = vpop.eup %585  ;;  %v484_v22 = vsel %vm115_vm0, %v482_v16, 0.0 }
 0x309   :  { %v485_v23 = vadd.f32 %v584_v15, %v484_v22  ;;  %v483_v24 = vsel %vm443_vm4, %v586_v17, 0.0  ;;  %v588_v25 = vpop.eup %587 }
 0x30a   :  { %v492_v26 = vsel %vm115_vm0, %v483_v24, 0.0 }
 0x30b   :  { %v486_v27 = vrot.slane %v485_v23, 4  ;;  %v493_v28 = vadd.f32 %v588_v25, %v492_v26 }
 0x30d   :  { %v487_v29 = vadd.f32 %v486_v27, %v485_v23  ;;  %v494_v30 = vrot.slane %v493_v28, 4 }
 0x30f   :  { %v488_v31 = vrot.slane %v487_v29, 2  ;;  %v495_v32 = vadd.f32 %v494_v30, %v493_v28 }
 0x311   :  { %v489_v33 = vadd.f32 %v488_v31, %v487_v29  ;;  %v496_v34 = vrot.slane %v495_v32, 2 }
 0x313   :  { %v490_v35 = vrot.slane %v489_v33, 1  ;;  %v497_v36 = vadd.f32 %v496_v34, %v495_v32 }
 0x315   :  { %v491_v37 = vadd.f32 %v490_v35, %v489_v33  ;;  %v498_v38 = vrot.slane %v497_v36, 1 }
 0x317   :  { %589 = vrcp.f32 %v491_v37  ;;  %v499_v39 = vadd.f32 %v498_v38, %v497_v36 }
 0x319   :  { %591 = vrcp.f32 %v499_v39 }
 0x321   :  { %v590_v18 = vpop.eup %589 }
 0x322   :  { %v504_v40 = vmul.f32 %v590_v18, %v582_v14  ;;  %v502_v41 = vmul.f32 %v590_v18, %v584_v15 }
 0x323   :  { %v592_v19 = vpop.eup %591 }
 0x324   :  { %v508_v42 = vsel %vm443_vm4, %v504_v40, %v757_v48  ;;  %v505_v43 = vmul.f32 %v592_v19, %v586_v17  ;;  %v503_v45 = vmul.f32 %v592_v19, %v588_v25  ;;  %510 = vst [vmem:[#allocation7] sm:$0xff] %v502_v41 }
 0x325   :  { %512 = vst [vmem:[#allocation7 + $0x10] sm:$0x3] %v508_v42 }
 0x326   :  { %v509_v46 = vsel %vm443_vm4, %v505_v43, %v759_v51  ;;  %511 = vst [vmem:[#allocation7 + $0x8] sm:$0xff] %v503_v45 }
 0x327   :  { %513 = vst [vmem:[#allocation7 + $0x18] sm:$0x3] %v509_v46 }
 0x328   :  { %648 = shalt.err (!%p645_p6)
}
 0x329   :  { %s649_s12 = scalar_lea.hbm %s800_s2, 512 }
 0x32a   :  { %p650_p7 = scmp.ne.s32.totalorder %s800_s2, %s649_s12  ;;  %p653_p8 = scmp.lt.u32.totalorder %s649_s12, %s800_s2 }
 0x32c   :  { %p655_p9 = pnand %p653_p8, %p650_p7 }
 0x32e   :  { %658 = shalt.err (!%p655_p9)
}
 0x32f   :  { %525 = dma.vmem_to_hbm [thread:$0]  %s520_s8, 512, %s800_s2, [#allocation4], %s666_s19, %s666_s19, %s667_s20  }
 0x330   :  { %663 = dma.done.wait [#allocation4], 512  }
 0x331   :  { %664 = vsyncadd [#allocation4], 4294966784 }
 0x332   :  { %529 = vsyncpa [#allocation3], 1 }
 0x333   :  { %530 = vsyncpa [#allocation6], 1 }
 0x334   :  { %531 = vsyncpa [#allocation4], 1 }

</bundles_post_ra>
